<compile_context>
chip_gen: v5e
topology: v5e:2x2
jax: 0.10.0
libtpu: 0.0.40
codegen_flags: <defaults>
</compile_context>

<pallas_src>
import functools

import jax
import jax.numpy as jnp
import numpy as np
from jax.experimental import pallas as pl
from jax.experimental.pallas import tpu as pltpu

_LANE = 128


# -----------------------------------------------------------------------------
# Pallas kernel: kinetic-energy assembly + Coulomb potential + combination.
# Layout: batch on lanes.
#   ec_ref   : [3, n_e, TB]  electron coordinates (x/y/z component slabs)
#   gsq_ref  : [1, TB]       |grad log psi|^2 (pre-reduced over components)
#   hess_ref : [3*n_e, TB]   diagonal second derivatives of log psi
#   out_ref  : [1, TB]       local energy (lane-dense store)
# -----------------------------------------------------------------------------
def _local_energy_kernel(ec_ref, gsq_ref, hess_ref, out_ref, *,
                         n_electrons, atom_xyz, charges, nn_repulsion,
                         grad_clip, min_distance, include_ee):
    n_e = n_electrons
    min_d2 = min_distance * min_distance    # 1/max(r, d) == rsqrt(max(r2, d^2))

    # ---- kinetic term:  -0.5 * (laplacian + |grad|^2)  (with clipping) ----
    h = hess_ref[...]                                        # [k, TB]
    finite = jnp.abs(h) < jnp.inf                            # isfinite (NaN->False)
    safe = jnp.where(finite, jnp.clip(h, -grad_clip, grad_clip), 0.0)
    lap = jnp.sum(safe, axis=0, keepdims=True)               # one sublane reduce
    kinetic = jnp.clip(-0.5 * (lap + gsq_ref[...]), -100.0, 100.0)   # [1, TB]

    # ---- potential term (nucleus-nucleus constant pre-folded) --------------
    ec = ec_ref[...]
    ex, ey, ez = ec[0], ec[1], ec[2]                         # [n_e, TB] slabs

    pot_rows = jnp.zeros_like(ex)                            # [n_e, TB] accum

    # electron-electron repulsion: full-width row-broadcast differences with an
    # upper-triangular (i > j) mask -> each unordered pair counted exactly once.
    if include_ee and n_e > 1:
        row_ids = jax.lax.broadcasted_iota(jnp.int32, ex.shape, 0)
        for j in range(n_e - 1):
            dx = ex - ex[j:j + 1, :]
            dy = ey - ey[j:j + 1, :]
            dz = ez - ez[j:j + 1, :]
            r2 = dx * dx + dy * dy + dz * dz
            inv = jax.lax.rsqrt(jnp.maximum(r2, min_d2))
            pot_rows = pot_rows + jnp.where(row_ids > j, inv, 0.0)

    # electron-nucleus attraction, vectorized over electrons (atom coords and
    # charges are compile-time Python constants).
    for a in range(len(charges)):
        ax, ay, az = atom_xyz[a]
        dx = ex - ax
        dy = ey - ay
        dz = ez - az
        r2 = dx * dx + dy * dy + dz * dz
        pot_rows = pot_rows - charges[a] * jax.lax.rsqrt(jnp.maximum(r2, min_d2))

    pot = nn_repulsion + jnp.sum(pot_rows, axis=0, keepdims=True)    # [1, TB]
    pot = jnp.clip(pot, -1000.0, 1000.0)

    out_ref[...] = kinetic + pot


# -----------------------------------------------------------------------------
# Tile selection: lane-dense tiles that divide the 128-padded batch (no extra
# padding pass), capped so double-buffered blocks stay well inside VMEM, and
# split into >=2 parallel steps when the whole batch would fit in one tile
# (so v7x can shard the grid across both TensorCores).
# -----------------------------------------------------------------------------
def _choose_batch_tile(batch, n_electrons):
    k = 3 * n_electrons
    pad8 = lambda n: -(-n // 8) * 8
    # double-buffered f32 bytes per batch column (inputs + output, with the
    # second-minor dim of each block padded to 8 sublanes)
    per_col = 2 * 4 * (3 * pad8(n_electrons) + pad8(k) + 8 + 8)
    budget = 20 * 1024 * 1024
    cap_units = max(1, min(32768 // _LANE, (budget // per_col) // _LANE))

    padded128 = pl.cdiv(batch, _LANE) * _LANE
    units = padded128 // _LANE

    steps = pl.cdiv(units, cap_units)
    if steps == 1 and units >= 2 and units % 2 == 0:
        steps = 2                          # give v7x's two cores >=2 steps
    tb_units = pl.cdiv(units, steps)
    tb = tb_units * _LANE
    padded = steps * tb                    # minimal padding (< one tile extra)
    return tb, padded


def _local_energy_pallas(ec3, gsq, hess_t, *, n_electrons, atom_xyz, charges,
                         nn_repulsion, grad_clip, min_distance, include_ee):
    """ec3: [3, n_e, B]; gsq: [1, B]; hess_t: [3*n_e, B]  (batch on lanes)."""
    _, n_e, batch = ec3.shape
    k = 3 * n_e
    tb, padded = _choose_batch_tile(batch, n_e)

    if padded != batch:                    # skipped when batch already aligned
        pad = padded - batch
        ec3 = jnp.pad(ec3, ((0, 0), (0, 0), (0, pad)))
        gsq = jnp.pad(gsq, ((0, 0), (0, pad)))
        hess_t = jnp.pad(hess_t, ((0, 0), (0, pad)))

    kernel = functools.partial(
        _local_energy_kernel,
        n_electrons=n_e, atom_xyz=atom_xyz, charges=charges,
        nn_repulsion=float(nn_repulsion), grad_clip=float(grad_clip),
        min_distance=float(min_distance), include_ee=bool(include_ee))

    out = pl.pallas_call(
        kernel,
        out_shape=jax.ShapeDtypeStruct((1, padded), jnp.float32),
        grid=(padded // tb,),
        in_specs=[
            pl.BlockSpec((3, n_e, tb), lambda i: (0, 0, i)),
            pl.BlockSpec((1, tb), lambda i: (0, i)),
            pl.BlockSpec((k, tb), lambda i: (0, i)),
        ],
        out_specs=pl.BlockSpec((1, tb), lambda i: (0, i)),
        compiler_params=pltpu.CompilerParams(
            dimension_semantics=("parallel",),
            vmem_limit_bytes=32 * 1024 * 1024),
    )(ec3, gsq, hess_t)
    return out[0, :batch]


# -----------------------------------------------------------------------------
# Module-equivalent wrapper
# -----------------------------------------------------------------------------
class LocalEnergyHamiltonian:
    """JAX/Pallas equivalent of the PyTorch LocalEnergyHamiltonian (method='log')."""

    def __init__(self, atom_coords, nuclear_charges=None, method='log',
                 grad_clip=50.0, min_distance=1e-10,
                 include_electron_electron=True):
        self.atom_coords = jnp.asarray(atom_coords, dtype=jnp.float32)
        if nuclear_charges is None:
            nuclear_charges = jnp.ones((self.atom_coords.shape[0],),
                                       dtype=jnp.float32)
        self.nuclear_charges = jnp.asarray(nuclear_charges, dtype=jnp.float32)
        self.method = method
        self.grad_clip = grad_clip
        self.min_distance = min_distance
        self.include_electron_electron = include_electron_electron
        # TODO(synk): only the default 'log' path is reproduced; the 'direct'
        #             method (-0.5 * lap(psi)/psi) and the torch try/except
        #             runtime fallbacks are not implemented.

        # ---- static, batch-independent constants baked into the kernel ----
        ac_np = np.asarray(self.atom_coords, dtype=np.float64)
        z_np = np.asarray(self.nuclear_charges, dtype=np.float64)
        self._atom_xyz = tuple(tuple(float(v) for v in row) for row in ac_np)
        self._charges = tuple(float(v) for v in z_np)

        n_atoms = ac_np.shape[0]
        nn = 0.0
        if n_atoms > 1:
            for a in range(n_atoms):
                for b in range(a + 1, n_atoms):
                    r = float(np.linalg.norm(ac_np[a] - ac_np[b]))
                    if r > min_distance:
                        nn += float(z_np[a] * z_np[b]) / r
        self._nn_repulsion = float(np.float32(nn))

    def __call__(self, wave_fn, electron_coords):
        """wave_fn: [B, n_e, 3] -> log|psi| [B];  returns local energy [B]."""
        electron_coords = jnp.asarray(electron_coords, dtype=jnp.float32)
        batch, n_e, _ = electron_coords.shape
        k = 3 * n_e

        # ----- autodiff glue -----
        grad_fn = jax.grad(lambda x: jnp.sum(wave_fn(x)))
        grad_log_psi, hvp = jax.linearize(grad_fn, electron_coords)  # [B,n_e,3]

        eye = jnp.eye(k, dtype=electron_coords.dtype).reshape(k, 1, n_e, 3)

        def diag_component(v):                      # v: [1, n_e, 3] one-hot
            hv = hvp(jnp.broadcast_to(v, electron_coords.shape))
            return jnp.sum(hv * v, axis=(1, 2))     # [B] diagonal 2nd deriv

        hess_diag_t = jax.vmap(diag_component)(eye)     # [k, B] (batch on lanes)

        # |grad log psi|^2 pre-reduced here: one read of the gradient, [B] out.
        # Cheaper than either transposing the full gradient in HBM or shipping
        # the full [k, B] slab into the kernel.
        gsq = jnp.sum(grad_log_psi * grad_log_psi, axis=(1, 2)).reshape(1, batch)

        # Electron coords as per-component [3, n_e, B] slabs (batch on lanes).
        ec3 = jnp.transpose(electron_coords, (2, 1, 0))

        return _local_energy_pallas(
            ec3, gsq, hess_diag_t,
            n_electrons=n_e,
            atom_xyz=self._atom_xyz, charges=self._charges,
            nn_repulsion=self._nn_repulsion,
            grad_clip=self.grad_clip, min_distance=self.min_distance,
            include_ee=self.include_electron_electron)


# -----------------------------------------------------------------------------
# Pure-JAX reference (same math as the PyTorch module, no Pallas)
# -----------------------------------------------------------------------------
def _reference_local_energy(wave_fn, electron_coords, atom_coords, charges,
                            grad_clip=50.0, min_distance=1e-10):
    batch, n_e, _ = electron_coords.shape
    n_atoms = atom_coords.shape[0]

    grad_fn = jax.grad(lambda x: jnp.sum(wave_fn(x)))
    g = grad_fn(electron_coords)
    grad_sq = jnp.sum(g ** 2, axis=(1, 2))
    lap = jnp.zeros(batch)
    for i in range(n_e):
        for j in range(3):
            sd = jax.grad(lambda x, i=i, j=j: jnp.sum(grad_fn(x)[:, i, j]))(
                electron_coords)[:, i, j]
            sd = jnp.where(jnp.isfinite(sd),
                           jnp.clip(sd, -grad_clip, grad_clip), 0.0)
            lap = lap + sd
    kinetic = jnp.clip(-0.5 * (lap + grad_sq), -100.0, 100.0)

    pot = jnp.zeros(batch)
    for i in range(n_e):
        for j in range(i + 1, n_e):
            r = jnp.linalg.norm(electron_coords[:, i] - electron_coords[:, j],
                                axis=1)
            pot = pot + 1.0 / jnp.maximum(r, min_distance)
    for i in range(n_e):
        for a in range(n_atoms):
            r = jnp.linalg.norm(electron_coords[:, i] - atom_coords[a], axis=1)
            pot = pot - charges[a] / jnp.maximum(r, min_distance)
    for a in range(n_atoms):
        for b in range(a + 1, n_atoms):
            r = jnp.linalg.norm(atom_coords[a] - atom_coords[b])
            pot = pot + jnp.where(r > min_distance,
                                  charges[a] * charges[b] / r, 0.0)
    pot = jnp.clip(pot, -1000.0, 1000.0)
    return kinetic + pot


# -----------------------------------------------------------------------------
# Main
# -----------------------------------------------------------------------------
if __name__ == "__main__":
    key = jax.random.PRNGKey(0)

    batch, n_electrons = 8, 4
    # Deterministic "buffers" (H2-like molecule)
    atom_coords = jnp.array([[0.0, 0.0, 0.0],
                             [0.0, 0.0, 1.4]], dtype=jnp.float32)
    nuclear_charges = jnp.array([1.0, 1.0], dtype=jnp.float32)

    electron_coords = jax.random.normal(
        key, (batch, n_electrons, 3), dtype=jnp.float32)

    # Deterministic analytic wave function: log|psi|(r) = -sum_{i,a} Z_a |r_i - R_a|
    def wave_fn(ec):
        diff = ec[:, :, None, :] - atom_coords[None, None, :, :]
        r = jnp.sqrt(jnp.sum(diff * diff, axis=-1) + 1e-12)
        return -jnp.sum(nuclear_charges[None, None, :] * r, axis=(1, 2))

    ham = LocalEnergyHamiltonian(atom_coords, nuclear_charges, method='log')

    e_local = ham(wave_fn, electron_coords)
    e_local = jax.block_until_ready(e_local)

    e_ref = _reference_local_energy(wave_fn, electron_coords, atom_coords,
                                    nuclear_charges)
    np.testing.assert_allclose(np.asarray(e_local), np.asarray(e_ref),
                               rtol=1e-3, atol=1e-2)

    print("KERNEL_OK")
</pallas_src>

<mosaic_0001>
module attributes {stable_mosaic.version = 11 : i64} {
  func.func @_local_energy_kernel(%arg0: i32, %arg1: memref<3x4x128xf32, #tpu.memory_space<vmem>>, %arg2: memref<1x128xf32, #tpu.memory_space<vmem>>, %arg3: memref<12x128xf32, #tpu.memory_space<vmem>>, %arg4: memref<1x128xf32, #tpu.memory_space<vmem>>) attributes {dimension_semantics = [#tpu.dimension_semantics<parallel>], iteration_bounds = array<i64: 1>, scalar_prefetch = 0 : i64, scratch_operands = 0 : i64, tpu.core_type = #tpu.core_type<tc>, window_params = [{transform_indices = @transform_0, window_bounds = array<i64: 3, 4, 128>}, {transform_indices = @transform_1, window_bounds = array<i64: 1, 128>}, {transform_indices = @transform_2, window_bounds = array<i64: 12, 128>}, {transform_indices = @transform_3, window_bounds = array<i64: 1, 128>}]} {
    %c0 = arith.constant 0 : index
    %c0_0 = arith.constant 0 : index
    %0 = vector.load %arg3[%c0, %c0_0] : memref<12x128xf32, #tpu.memory_space<vmem>>, vector<12x128xf32>
    %1 = math.absf %0 : vector<12x128xf32>
    %cst = arith.constant 0x7F800000 : f32
    %2 = vector.broadcast %cst : f32 to vector<12x128xf32>
    %3 = arith.cmpf olt, %1, %2 : vector<12x128xf32>
    %cst_1 = arith.constant -5.000000e+01 : f32
    %cst_2 = arith.constant 5.000000e+01 : f32
    %4 = vector.broadcast %cst_1 : f32 to vector<12x128xf32>
    %5 = arith.maximumf %4, %0 : vector<12x128xf32>
    %6 = vector.broadcast %cst_2 : f32 to vector<12x128xf32>
    %7 = arith.minimumf %6, %5 : vector<12x128xf32>
    %cst_3 = arith.constant 0.000000e+00 : f32
    %8 = vector.broadcast %cst_3 : f32 to vector<12x128xf32>
    %9 = arith.select %3, %7, %8 : vector<12x128xi1>, vector<12x128xf32>
    %cst_4 = arith.constant dense<0.000000e+00> : vector<128xf32>
    %10 = vector.multi_reduction <add>, %9, %cst_4 [0] : vector<12x128xf32> to vector<128xf32>
    %11 = vector.shape_cast %10 : vector<128xf32> to vector<1x128xf32>
    %c0_5 = arith.constant 0 : index
    %c0_6 = arith.constant 0 : index
    %12 = vector.load %arg2[%c0_5, %c0_6] : memref<1x128xf32, #tpu.memory_space<vmem>>, vector<1x128xf32>
    %13 = arith.addf %11, %12 : vector<1x128xf32>
    %cst_7 = arith.constant -5.000000e-01 : f32
    %14 = vector.broadcast %cst_7 : f32 to vector<1x128xf32>
    %15 = arith.mulf %14, %13 : vector<1x128xf32>
    %cst_8 = arith.constant -1.000000e+02 : f32
    %cst_9 = arith.constant 1.000000e+02 : f32
    %16 = vector.broadcast %cst_8 : f32 to vector<1x128xf32>
    %17 = arith.maximumf %16, %15 : vector<1x128xf32>
    %18 = vector.broadcast %cst_9 : f32 to vector<1x128xf32>
    %19 = arith.minimumf %18, %17 : vector<1x128xf32>
    %c0_10 = arith.constant 0 : index
    %c0_11 = arith.constant 0 : index
    %c0_12 = arith.constant 0 : index
    %20 = vector.load %arg1[%c0_10, %c0_11, %c0_12] : memref<3x4x128xf32, #tpu.memory_space<vmem>>, vector<3x4x128xf32>
    %21 = vector.extract_strided_slice %20 {offsets = [0, 0, 0], sizes = [1, 4, 128], strides = [1, 1, 1]} : vector<3x4x128xf32> to vector<1x4x128xf32>
    %22 = vector.shape_cast %21 : vector<1x4x128xf32> to vector<4x128xf32>
    %23 = vector.extract_strided_slice %20 {offsets = [1, 0, 0], sizes = [1, 4, 128], strides = [1, 1, 1]} : vector<3x4x128xf32> to vector<1x4x128xf32>
    %24 = vector.shape_cast %23 : vector<1x4x128xf32> to vector<4x128xf32>
    %25 = vector.extract_strided_slice %20 {offsets = [2, 0, 0], sizes = [1, 4, 128], strides = [1, 1, 1]} : vector<3x4x128xf32> to vector<1x4x128xf32>
    %26 = vector.shape_cast %25 : vector<1x4x128xf32> to vector<4x128xf32>
    %cst_13 = arith.constant 0.000000e+00 : f32
    %27 = vector.broadcast %cst_13 : f32 to vector<4x128xf32>
    %28 = tpu.iota {dimensions = array<i32: 0>} : vector<4x128xi32>
    %29 = vector.extract_strided_slice %22 {offsets = [0, 0], sizes = [1, 128], strides = [1, 1]} : vector<4x128xf32> to vector<1x128xf32>
    %30 = vector.broadcast %29 : vector<1x128xf32> to vector<4x128xf32>
    %31 = arith.subf %22, %30 : vector<4x128xf32>
    %32 = vector.extract_strided_slice %24 {offsets = [0, 0], sizes = [1, 128], strides = [1, 1]} : vector<4x128xf32> to vector<1x128xf32>
    %33 = vector.broadcast %32 : vector<1x128xf32> to vector<4x128xf32>
    %34 = arith.subf %24, %33 : vector<4x128xf32>
    %35 = vector.extract_strided_slice %26 {offsets = [0, 0], sizes = [1, 128], strides = [1, 1]} : vector<4x128xf32> to vector<1x128xf32>
    %36 = vector.broadcast %35 : vector<1x128xf32> to vector<4x128xf32>
    %37 = arith.subf %26, %36 : vector<4x128xf32>
    %38 = arith.mulf %31, %31 : vector<4x128xf32>
    %39 = arith.mulf %34, %34 : vector<4x128xf32>
    %40 = arith.addf %38, %39 : vector<4x128xf32>
    %41 = arith.mulf %37, %37 : vector<4x128xf32>
    %42 = arith.addf %40, %41 : vector<4x128xf32>
    %cst_14 = arith.constant 9.99999968E-21 : f32
    %43 = vector.broadcast %cst_14 : f32 to vector<4x128xf32>
    %44 = arith.maximumf %42, %43 : vector<4x128xf32>
    %45 = math.rsqrt %44 : vector<4x128xf32>
    %c0_i32 = arith.constant 0 : i32
    %46 = vector.broadcast %c0_i32 : i32 to vector<4x128xi32>
    %47 = arith.cmpi sgt, %28, %46 : vector<4x128xi32>
    %cst_15 = arith.constant 0.000000e+00 : f32
    %48 = vector.broadcast %cst_15 : f32 to vector<4x128xf32>
    %49 = arith.select %47, %45, %48 : vector<4x128xi1>, vector<4x128xf32>
    %50 = arith.addf %27, %49 : vector<4x128xf32>
    %51 = vector.extract_strided_slice %22 {offsets = [1, 0], sizes = [1, 128], strides = [1, 1]} : vector<4x128xf32> to vector<1x128xf32>
    %52 = vector.broadcast %51 : vector<1x128xf32> to vector<4x128xf32>
    %53 = arith.subf %22, %52 : vector<4x128xf32>
    %54 = vector.extract_strided_slice %24 {offsets = [1, 0], sizes = [1, 128], strides = [1, 1]} : vector<4x128xf32> to vector<1x128xf32>
    %55 = vector.broadcast %54 : vector<1x128xf32> to vector<4x128xf32>
    %56 = arith.subf %24, %55 : vector<4x128xf32>
    %57 = vector.extract_strided_slice %26 {offsets = [1, 0], sizes = [1, 128], strides = [1, 1]} : vector<4x128xf32> to vector<1x128xf32>
    %58 = vector.broadcast %57 : vector<1x128xf32> to vector<4x128xf32>
    %59 = arith.subf %26, %58 : vector<4x128xf32>
    %60 = arith.mulf %53, %53 : vector<4x128xf32>
    %61 = arith.mulf %56, %56 : vector<4x128xf32>
    %62 = arith.addf %60, %61 : vector<4x128xf32>
    %63 = arith.mulf %59, %59 : vector<4x128xf32>
    %64 = arith.addf %62, %63 : vector<4x128xf32>
    %cst_16 = arith.constant 9.99999968E-21 : f32
    %65 = vector.broadcast %cst_16 : f32 to vector<4x128xf32>
    %66 = arith.maximumf %64, %65 : vector<4x128xf32>
    %67 = math.rsqrt %66 : vector<4x128xf32>
    %c1_i32 = arith.constant 1 : i32
    %68 = vector.broadcast %c1_i32 : i32 to vector<4x128xi32>
    %69 = arith.cmpi sgt, %28, %68 : vector<4x128xi32>
    %cst_17 = arith.constant 0.000000e+00 : f32
    %70 = vector.broadcast %cst_17 : f32 to vector<4x128xf32>
    %71 = arith.select %69, %67, %70 : vector<4x128xi1>, vector<4x128xf32>
    %72 = arith.addf %50, %71 : vector<4x128xf32>
    %73 = vector.extract_strided_slice %22 {offsets = [2, 0], sizes = [1, 128], strides = [1, 1]} : vector<4x128xf32> to vector<1x128xf32>
    %74 = vector.broadcast %73 : vector<1x128xf32> to vector<4x128xf32>
    %75 = arith.subf %22, %74 : vector<4x128xf32>
    %76 = vector.extract_strided_slice %24 {offsets = [2, 0], sizes = [1, 128], strides = [1, 1]} : vector<4x128xf32> to vector<1x128xf32>
    %77 = vector.broadcast %76 : vector<1x128xf32> to vector<4x128xf32>
    %78 = arith.subf %24, %77 : vector<4x128xf32>
    %79 = vector.extract_strided_slice %26 {offsets = [2, 0], sizes = [1, 128], strides = [1, 1]} : vector<4x128xf32> to vector<1x128xf32>
    %80 = vector.broadcast %79 : vector<1x128xf32> to vector<4x128xf32>
    %81 = arith.subf %26, %80 : vector<4x128xf32>
    %82 = arith.mulf %75, %75 : vector<4x128xf32>
    %83 = arith.mulf %78, %78 : vector<4x128xf32>
    %84 = arith.addf %82, %83 : vector<4x128xf32>
    %85 = arith.mulf %81, %81 : vector<4x128xf32>
    %86 = arith.addf %84, %85 : vector<4x128xf32>
    %cst_18 = arith.constant 9.99999968E-21 : f32
    %87 = vector.broadcast %cst_18 : f32 to vector<4x128xf32>
    %88 = arith.maximumf %86, %87 : vector<4x128xf32>
    %89 = math.rsqrt %88 : vector<4x128xf32>
    %c2_i32 = arith.constant 2 : i32
    %90 = vector.broadcast %c2_i32 : i32 to vector<4x128xi32>
    %91 = arith.cmpi sgt, %28, %90 : vector<4x128xi32>
    %cst_19 = arith.constant 0.000000e+00 : f32
    %92 = vector.broadcast %cst_19 : f32 to vector<4x128xf32>
    %93 = arith.select %91, %89, %92 : vector<4x128xi1>, vector<4x128xf32>
    %94 = arith.addf %72, %93 : vector<4x128xf32>
    %cst_20 = arith.constant 0.000000e+00 : f32
    %95 = vector.broadcast %cst_20 : f32 to vector<4x128xf32>
    %96 = arith.subf %22, %95 : vector<4x128xf32>
    %cst_21 = arith.constant 0.000000e+00 : f32
    %97 = vector.broadcast %cst_21 : f32 to vector<4x128xf32>
    %98 = arith.subf %24, %97 : vector<4x128xf32>
    %cst_22 = arith.constant 0.000000e+00 : f32
    %99 = vector.broadcast %cst_22 : f32 to vector<4x128xf32>
    %100 = arith.subf %26, %99 : vector<4x128xf32>
    %101 = arith.mulf %96, %96 : vector<4x128xf32>
    %102 = arith.mulf %98, %98 : vector<4x128xf32>
    %103 = arith.addf %101, %102 : vector<4x128xf32>
    %104 = arith.mulf %100, %100 : vector<4x128xf32>
    %105 = arith.addf %103, %104 : vector<4x128xf32>
    %cst_23 = arith.constant 9.99999968E-21 : f32
    %106 = vector.broadcast %cst_23 : f32 to vector<4x128xf32>
    %107 = arith.maximumf %105, %106 : vector<4x128xf32>
    %108 = math.rsqrt %107 : vector<4x128xf32>
    %cst_24 = arith.constant 1.000000e+00 : f32
    %109 = vector.broadcast %cst_24 : f32 to vector<4x128xf32>
    %110 = arith.mulf %109, %108 : vector<4x128xf32>
    %111 = arith.subf %94, %110 : vector<4x128xf32>
    %cst_25 = arith.constant 0.000000e+00 : f32
    %112 = vector.broadcast %cst_25 : f32 to vector<4x128xf32>
    %113 = arith.subf %22, %112 : vector<4x128xf32>
    %cst_26 = arith.constant 0.000000e+00 : f32
    %114 = vector.broadcast %cst_26 : f32 to vector<4x128xf32>
    %115 = arith.subf %24, %114 : vector<4x128xf32>
    %cst_27 = arith.constant 1.400000e+00 : f32
    %116 = vector.broadcast %cst_27 : f32 to vector<4x128xf32>
    %117 = arith.subf %26, %116 : vector<4x128xf32>
    %118 = arith.mulf %113, %113 : vector<4x128xf32>
    %119 = arith.mulf %115, %115 : vector<4x128xf32>
    %120 = arith.addf %118, %119 : vector<4x128xf32>
    %121 = arith.mulf %117, %117 : vector<4x128xf32>
    %122 = arith.addf %120, %121 : vector<4x128xf32>
    %cst_28 = arith.constant 9.99999968E-21 : f32
    %123 = vector.broadcast %cst_28 : f32 to vector<4x128xf32>
    %124 = arith.maximumf %122, %123 : vector<4x128xf32>
    %125 = math.rsqrt %124 : vector<4x128xf32>
    %cst_29 = arith.constant 1.000000e+00 : f32
    %126 = vector.broadcast %cst_29 : f32 to vector<4x128xf32>
    %127 = arith.mulf %126, %125 : vector<4x128xf32>
    %128 = arith.subf %111, %127 : vector<4x128xf32>
    %cst_30 = arith.constant dense<0.000000e+00> : vector<128xf32>
    %129 = vector.multi_reduction <add>, %128, %cst_30 [0] : vector<4x128xf32> to vector<128xf32>
    %130 = vector.shape_cast %129 : vector<128xf32> to vector<1x128xf32>
    %cst_31 = arith.constant 0.714285731 : f32
    %131 = vector.broadcast %cst_31 : f32 to vector<1x128xf32>
    %132 = arith.addf %131, %130 : vector<1x128xf32>
    %cst_32 = arith.constant -1.000000e+03 : f32
    %cst_33 = arith.constant 1.000000e+03 : f32
    %133 = vector.broadcast %cst_32 : f32 to vector<1x128xf32>
    %134 = arith.maximumf %133, %132 : vector<1x128xf32>
    %135 = vector.broadcast %cst_33 : f32 to vector<1x128xf32>
    %136 = arith.minimumf %135, %134 : vector<1x128xf32>
    %137 = arith.addf %19, %136 : vector<1x128xf32>
    %c0_34 = arith.constant 0 : index
    %c0_35 = arith.constant 0 : index
    %138 = vector.load %arg4[%c0_34, %c0_35] : memref<1x128xf32, #tpu.memory_space<vmem>>, vector<1x128xf32>
    tpu.vector_store %arg4[%c0_34, %c0_35], %137 {strides = array<i32>} : memref<1x128xf32, #tpu.memory_space<vmem>>, vector<1x128xf32>,
    return
  }
  func.func @transform_0(%arg0: i32) -> (i32, i32, i32) {
    %c0_i32 = arith.constant 0 : i32
    %c0_i32_0 = arith.constant 0 : i32
    %c0_i32_1 = arith.constant 0 : i32
    return %c0_i32, %c0_i32_0, %arg0 : i32, i32, i32
  }
  func.func @transform_1(%arg0: i32) -> (i32, i32) {
    %c0_i32 = arith.constant 0 : i32
    %c0_i32_0 = arith.constant 0 : i32
    return %c0_i32, %arg0 : i32, i32
  }
  func.func @transform_2(%arg0: i32) -> (i32, i32) {
    %c0_i32 = arith.constant 0 : i32
    %c0_i32_0 = arith.constant 0 : i32
    return %c0_i32, %arg0 : i32, i32
  }
  func.func @transform_3(%arg0: i32) -> (i32, i32) {
    %c0_i32 = arith.constant 0 : i32
    %c0_i32_0 = arith.constant 0 : i32
    return %c0_i32, %arg0 : i32, i32
  }
}

</mosaic_0001>

<bundles_post_ra>
// kernel: tpu_custom_call.1
= control target key start
LH: loop header
LB: loop body
LE: loop exit
PB: predicated region body
PF: predicated region fallthrough
CT: control target
= control target key end

     0   :  { %8 = vsyncpa [#allocation3], 0  ;;  %s417_s0 = inlined_call_operand.hbm [shape: f32[3,4,128], index: 0, kind: input, shape index: {}]   ;;  %s418_s1 = inlined_call_operand.hbm [shape: f32[1,128], index: 1, kind: input, shape index: {}]   ;;  %s419_s2 = inlined_call_operand.hbm [shape: f32[12,128], index: 2, kind: input, shape index: {}]   ;;  %s420_s3 = inlined_call_operand.hbm [shape: f32[1,128], index: 3, kind: output, shape index: {}]  }
   0x1   :  { %9 = vsyncpa [#allocation6], 0  ;;  %s29_s14 = sshll.u32 %s418_s1, 4  ;;  %s30_s14 = int_to_ptr.hbm [resolvable:$true] %s29_s14 }
   0x2   :  { %10 = vsyncpa [#allocation4], 0  ;;  %s353_s15 = smov [#allocation5]   ;;  %s15_s19 = sshll.u32 %s417_s0, 4  ;;  %s16_s19 = int_to_ptr.hbm [resolvable:$true] %s15_s19 }
   0x3   :  { %s31_s16 = sshll.u32 %s353_s15, 4  ;;  %s354_s20 = smov [#allocation2]   ;;  %s32_s16 = int_to_ptr.vmem [resolvable:$true] %s31_s16 }
   0x4   :  { %34 = dma.hbm_to_vmem [thread:$0]  %s30_s14, 16, %s32_s16, [#allocation6]  }
   0x5   :  { %s17_s21 = sshll.u32 %s354_s20, 4  ;;  %s355_s22 = smov 64   ;;  %s18_s21 = int_to_ptr.vmem [resolvable:$true] %s17_s21 }
   0x6   :  { %s356_s23 = smov 4   ;;  %s39_s1 = sshll.u32 %s419_s2, 4  ;;  %s40_s1 = int_to_ptr.hbm [resolvable:$true] %s39_s1 }
   0x7   :  { %23 = dma.hbm_to_vmem [thread:$0]  %s16_s19, 192, %s18_s21, [#allocation3], %s355_s22, %s355_s22, %s356_s23  }
   0x8   :  { %s357_s26 = smov [#allocation7]   ;;  %s358_s28 = smov 128  }
   0x9   :  { %s41_s27 = sshll.u32 %s357_s26, 4  ;;  %s359_s29 = smov 8   ;;  %s42_s27 = int_to_ptr.vmem [resolvable:$true] %s41_s27 }
   0xa   :  { %47 = dma.hbm_to_vmem [thread:$0]  %s40_s1, 256, %s42_s27, [#allocation6], %s358_s28, %s358_s28, %s359_s29  }
   0xb   :  { %347 = dma.done.wait [#allocation3], 192  }
   0xc   :  { %348 = vsyncadd [#allocation3], 4294967104 }
   0xd   :  { %349 = dma.done.wait [#allocation6], 272  }
   0xe   :  { %350 = vsyncadd [#allocation6], 4294967024  ;;  %v86_v0 = vld [vmem:[#allocation2] sm:$0xf]  ;;  %v87_v1 = vld [vmem:[#allocation2 + $0x4] sm:$0xf]  ;;  %v89_v58 = vlaneseq }
   0xf   :  { %v88_v2 = vld [vmem:[#allocation2 + $0x8] sm:$0xf]  ;;  %v91_v3 = vperm.slane %v86_v0, 0  ;;  %v93_v4 = vperm.slane %v87_v1, 0  ;;  %v116_v6 = vperm.slane %v86_v0, 1  ;;  %v118_v9 = vperm.slane %v87_v1, 1 }
  0x10   :  { %v95_v5 = vperm.slane %v88_v2, 0  ;;  %v120_v12 = vperm.slane %v88_v2, 1  ;;  %v60_v13 = vld [vmem:[#allocation7] sm:$0xff]  ;;  %v61_v14 = vld [vmem:[#allocation7 + $0x8] sm:$0xf]  ;;  %v141_v23 = vperm.slane %v86_v0, 2  ;;  %v166_v35 = vmul.f32 %v86_v0, %v86_v0 }
  0x11   :  { %v92_v7 = vsub.f32 %v86_v0, %v91_v3  ;;  %v94_v8 = vsub.f32 %v87_v1, %v93_v4  ;;  %v117_v11 = vsub.f32 %v86_v0, %v116_v6  ;;  %v119_v17 = vsub.f32 %v87_v1, %v118_v9  ;;  %s360_s0 = smov [#allocation8]   ;;  %s217_s5 = sshll.u32 %s420_s3, 4  ;;  %s218_s5 = int_to_ptr.hbm [resolvable:$true] %s217_s5 }
  0x12   :  { %v96_v10 = vsub.f32 %v88_v2, %v95_v5  ;;  %v121_v19 = vsub.f32 %v88_v2, %v120_v12  ;;  %v143_v24 = vperm.slane %v87_v1, 2  ;;  %v62_v25 = vand.u32 2147483647, %v60_v13  ;;  %s215_s2 = sshll.u32 %s360_s0, 4  ;;  %s216_s2 = int_to_ptr.vmem [resolvable:$true] %s215_s2 }
  0x13   :  { %v97_v15 = vmul.f32 %v92_v7, %v92_v7  ;;  %v98_v16 = vmul.f32 %v94_v8, %v94_v8  ;;  %v122_v20 = vmul.f32 %v117_v11, %v117_v11  ;;  %v123_v22 = vmul.f32 %v119_v17, %v119_v17 }
  0x14   :  { %v100_v18 = vmul.f32 %v96_v10, %v96_v10  ;;  %v63_v26 = vand.u32 2147483647, %v61_v14  ;;  %v125_v27 = vmul.f32 %v121_v19, %v121_v19  ;;  %v145_v28 = vperm.slane %v88_v2, 2 }
  0x15   :  { %v99_v21 = vadd.f32 %v98_v16, %v97_v15  ;;  %v124_v30 = vadd.f32 %v123_v22, %v122_v20  ;;  %v142_v31 = vsub.f32 %v86_v0, %v141_v23  ;;  %v144_v32 = vsub.f32 %v87_v1, %v143_v24 }
  0x16   :  { %v229_v33 = vclamps-f32 %v61_v14, 50.0  ;;  %v146_v34 = vsub.f32 %v88_v2, %v145_v28  ;;  %v167_v36 = vmul.f32 %v87_v1, %v87_v1  ;;  %vm65_vm0 = vcmp.lt.f32.partialorder %v63_v26, inf }
  0x17   :  { %v101_v29 = vadd.f32 %v100_v18, %v99_v21  ;;  %v126_v38 = vadd.f32 %v125_v27, %v124_v30  ;;  %v147_v39 = vmul.f32 %v142_v31, %v142_v31  ;;  %v148_v40 = vmul.f32 %v144_v32, %v144_v32 }
  0x18   :  { %v150_v41 = vmul.f32 %v146_v34, %v146_v34  ;;  %v168_v42 = vadd.f32 %v167_v36, %v166_v35  ;;  %v169_v43 = vmul.f32 %v88_v2, %v88_v2  ;;  %v228_v46 = vclamps-f32 %v60_v13, 50.0 }
  0x19   :  { %v102_v37 = vmax.f32 %v101_v29, 1e-20  ;;  %v127_v44 = vmax.f32 %v126_v38, 1e-20  ;;  %v149_v45 = vadd.f32 %v148_v40, %v147_v39  ;;  %vm72_vm1 = vcmask 1043456  }
  0x1a   :  { %v170_v47 = vadd.f32 %v169_v43, %v168_v42  ;;  %v231_v48 = vadd.f32 -1.4, %v88_v2  ;;  %vm64_vm2 = vcmp.lt.f32.partialorder %v62_v25, inf  ;;  %v71_v49 = vsel %vm65_vm0, %v229_v33, 0.0 }
  0x1b   :  { %241 = vrsqrt.f32 %v102_v37  ;;  %v151_v50 = vadd.f32 %v150_v41, %v149_v45  ;;  %v70_v54 = vsel %vm64_vm2, %v228_v46, 0.0  ;;  %v73_v55 = vsel %vm72_vm1, %v71_v49, 0.0  ;;  %v81_v49 = vld [vmem:[#allocation5] sm:$0x1] }
  0x1c   :  { %243 = vrsqrt.f32 %v127_v44  ;;  %v390_v51 = vmax.f32 %v170_v47, 1e-20  ;;  %v184_v52 = vmul.f32 %v231_v48, %v231_v48  ;;  %v74_v62 = vadd.f32 %v73_v55, %v70_v54 }
  0x1d   :  { %v152_v53 = vmax.f32 %v151_v50, 1e-20  ;;  %v90_v1 = vshrl.u32 %v89_v58, 7  ;;  %vm109_vm3 = vweird.f32 %v102_v37  ;;  %vm134_vm5 = vweird.f32 %v127_v44 }
  0x1e   :  { %245 = vrsqrt.f32 %v390_v51  ;;  %v185_v56 = vadd.f32 %v184_v52, %v168_v42  ;;  %v75_v6 = vrot.slane %v74_v62, 4  ;;  %vm178_vm13 = vweird.f32 %v390_v51 }
  0x1f   :  { %247 = vrsqrt.f32 %v152_v53  ;;  %vm113_vm8 = vcmp.gt.s32.totalorder %v90_v1, 0  ;;  %vm138_vm9 = vcmp.gt.s32.totalorder %v90_v1, 1  ;;  %vm159_vm11 = vweird.f32 %v152_v53 }
  0x20   :  { %v186_v60 = vmax.f32 %v185_v56, 1e-20  ;;  %v76_v17 = vadd.f32 %v75_v6, %v74_v62  ;;  %vm163_vm15 = vcmp.gt.s32.totalorder %v90_v1, 2 }
  0x21   :  { %v242_v57 = vpop.eup %241 }
  0x22   :  { %v104_v59 = vmul.f32 %v242_v57, %v102_v37  ;;  %v244_v61 = vpop.eup %243  ;;  %249 = vrsqrt.f32 %v186_v60  ;;  %vm110_vm4 = vweird.f32 %v242_v57  ;;  %v77_v29 = vrot.slane %v76_v17, 2 }
  0x23   :  { %v129_v0 = vmul.f32 %v244_v61, %v127_v44  ;;  %vm135_vm6 = vweird.f32 %v244_v61  ;;  %vm395_vm7 = vmor %vm109_vm3, %vm110_vm4  ;;  %vm193_vm2 = vweird.f32 %v186_v60 }
  0x24   :  { %v105_v63 = vmul.f32 %v242_v57, %v104_v59  ;;  %v246_v2 = vpop.eup %245  ;;  %vm400_vm10 = vmor %vm134_vm5, %vm135_vm6  ;;  %v78_v37 = vadd.f32 %v77_v29, %v76_v17 }
  0x25   :  { %v130_v4 = vmul.f32 %v244_v61, %v129_v0  ;;  %v248_v5 = vpop.eup %247  ;;  %v173_v7 = vmul.f32 %v246_v2, %v390_v51  ;;  %vm179_vm14 = vweird.f32 %v246_v2 }
  0x26   :  { %v106_v3 = vmul.f32 0.5, %v105_v63  ;;  %v154_v10 = vmul.f32 %v248_v5, %v152_v53  ;;  %vm160_vm12 = vweird.f32 %v248_v5  ;;  %vm180_vm3 = vmor %vm178_vm13, %vm179_vm14  ;;  %v79_v44 = vrot.slane %v78_v37, 1 }
  0x27   :  { %v131_v9 = vmul.f32 0.5, %v130_v4  ;;  %v174_v12 = vmul.f32 %v246_v2, %v173_v7  ;;  %vm161_vm0 = vmor %vm159_vm11, %vm160_vm12 }
  0x28   :  { %v107_v8 = vsub.f32 1.5, %v106_v3  ;;  %v155_v15 = vmul.f32 %v248_v5, %v154_v10  ;;  %v250_v16 = vpop.eup %249  ;;  %v80_v47 = vadd.f32 %v79_v44, %v78_v37 }
  0x29   :  { %v132_v14 = vsub.f32 1.5, %v131_v9  ;;  %v175_v19 = vmul.f32 0.5, %v174_v12  ;;  %v188_v23 = vmul.f32 %v250_v16, %v186_v60  ;;  %vm194_vm4 = vweird.f32 %v250_v16 }
  0x2a   :  { %v108_v13 = vmul.f32 %v242_v57, %v107_v8  ;;  %v156_v22 = vmul.f32 0.5, %v155_v15  ;;  %vm195_vm5 = vmor %vm193_vm2, %vm194_vm4  ;;  %v82_v51 = vadd.f32 %v81_v49, %v80_v47 }
  0x2b   :  { %v133_v21 = vmul.f32 %v244_v61, %v132_v14  ;;  %v176_v25 = vsub.f32 1.5, %v175_v19  ;;  %v189_v28 = vmul.f32 %v250_v16, %v188_v23 }
  0x2c   :  { %v112_v20 = vsel %vm395_vm7, %v242_v57, %v108_v13  ;;  %v157_v27 = vsub.f32 1.5, %v156_v22  ;;  %v83_v54 = vmul.f32 -0.5, %v82_v51 }
  0x2d   :  { %v114_v24 = vsel %vm113_vm8, %v112_v20, 0.0  ;;  %v137_v26 = vsel %vm400_vm10, %v244_v61, %v133_v21  ;;  %v177_v31 = vmul.f32 %v246_v2, %v176_v25  ;;  %v190_v34 = vmul.f32 0.5, %v189_v28 }
  0x2e   :  { %v139_v30 = vsel %vm138_vm9, %v137_v26, 0.0  ;;  %v158_v33 = vmul.f32 %v248_v5, %v157_v27  ;;  %v230_v57 = vclamps-f32 %v83_v54, 100.0 }
  0x2f   :  { %v140_v32 = vadd.f32 %v139_v30, %v114_v24  ;;  %v191_v36 = vsub.f32 1.5, %v190_v34  ;;  %v181_v39 = vsel %vm180_vm3, %v246_v2, %v177_v31 }
  0x30   :  { %v162_v35 = vsel %vm161_vm0, %v248_v5, %v158_v33 }
  0x31   :  { %v164_v38 = vsel %vm163_vm15, %v162_v35, 0.0  ;;  %v192_v41 = vmul.f32 %v250_v16, %v191_v36 }
  0x32   :  { %v165_v40 = vadd.f32 %v164_v38, %v140_v32 }
  0x33   :  { %v196_v43 = vsel %vm195_vm5, %v250_v16, %v192_v41 }
  0x34   :  { %v182_v42 = vsub.f32 %v165_v40, %v181_v39 }
  0x36   :  { %v197_v45 = vsub.f32 %v182_v42, %v196_v43 }
  0x38   :  { %v198_v46 = vsel %vm72_vm1, %v197_v45, 0.0 }
  0x39   :  { %v199_v48 = vrot.slane %v198_v46, 4 }
  0x3b   :  { %v200_v50 = vadd.f32 %v199_v48, %v198_v46 }
  0x3d   :  { %v201_v52 = vrot.slane %v200_v50, 2 }
  0x3f   :  { %v202_v53 = vadd.f32 %v201_v52, %v200_v50 }
  0x41   :  { %v203_v55 = vrot.slane %v202_v53, 1 }
  0x43   :  { %v204_v56 = vadd.f32 %v203_v55, %v202_v53 }
  0x45   :  { %v205_v58 = vadd.f32 0.71428573, %v204_v56 }
  0x47   :  { %v232_v59 = vclamps-f32 %v205_v58, 1000.0 }
  0x49   :  { %v208_v60 = vadd.f32 %v232_v59, %v230_v57 }
  0x4b   :  { %209 = vst [vmem:[#allocation8] sm:$0x1] %v208_v60 }
  0x4c   :  { %220 = dma.vmem_to_hbm [thread:$0]  %s216_s2, 16, %s218_s5, [#allocation4]  }
  0x4d   :  { %351 = dma.done.wait [#allocation4], 16  }
  0x4e   :  { %352 = vsyncadd [#allocation4], 4294967280 }
  0x4f   :  { %225 = vsyncpa [#allocation3], 1 }
  0x50   :  { %226 = vsyncpa [#allocation6], 1 }
  0x51   :  { %227 = vsyncpa [#allocation4], 1 }

</bundles_post_ra>
